<compile_context>
chip_gen: v6e
topology: v6e:2x2x1
jax: 0.10.0
libtpu: 0.0.40
codegen_flags: <defaults>
</compile_context>

<pallas_src>
import functools
import math

import jax
import jax.numpy as jnp
from jax.experimental import pallas as pl
from jax.experimental.pallas import tpu as pltpu


# --------------------------------------------------------------------------
# sizing helpers
# --------------------------------------------------------------------------

def _vmem_capacity_bytes():
    """Per-core VMEM capacity; conservative (v7x) fallback if unavailable."""
    try:
        return int(pltpu.get_tpu_info().vmem_capacity_bytes)
    except Exception:
        return 64 * 1024 * 1024


def _tile(dim, target, align):
    """Largest tile <= target that is a multiple of `align` and divides `dim`.

    Falls back to the full dimension (full-extent blocks are always legal).
    """
    if dim <= target:
        return dim
    t = (target // align) * align
    while t >= align:
        if dim % t == 0:
            return t
        t -= align
    return dim


# --------------------------------------------------------------------------
# kernel 1: tiled linear projections (shared x tile, n_out weight/output sets)
# --------------------------------------------------------------------------

def _make_proj_kernel(n_out):
    """y_i = x @ W_i^T + b_i for i in range(n_out), sharing the x tile load."""

    def kernel(*refs):
        x_ref = refs[0]
        w_refs = refs[1:1 + n_out]
        b_refs = refs[1 + n_out:1 + 2 * n_out]
        o_refs = refs[1 + 2 * n_out:1 + 3 * n_out]
        acc_refs = refs[1 + 3 * n_out:]
        kk = pl.program_id(2)

        @pl.when(kk == 0)
        def _init():
            for acc in acc_refs:
                acc[...] = jnp.zeros(acc.shape, acc.dtype)

        x = x_ref[...]                         # already in compute dtype
        for w_ref, acc in zip(w_refs, acc_refs):
            # Contract x's dim 1 with W's dim 1: x @ W^T directly in W's
            # stored [D_out, D_in] layout -- no transposed weight copy.
            acc[...] += jax.lax.dot_general(
                x, w_ref[...], (((1,), (1,)), ((), ())),
                preferred_element_type=jnp.float32)

        @pl.when(kk == pl.num_programs(2) - 1)
        def _finalize():
            for b_ref, o_ref, acc in zip(b_refs, o_refs, acc_refs):
                o_ref[...] = (acc[...] + b_ref[...]).astype(o_ref.dtype)

    return kernel


def _proj_tile_sizes(M, D_in, D_out, n_out, x_bytes, w_bytes, o_bytes, budget):
    """VMEM-budget-aware tile sizing for the projection kernel."""
    tm_t, tn_t, tk_t = 512, 256, 1024        # bigger tiles -> fewer grid steps

    def est(tm_t, tn_t, tk_t):
        tm, tn, tk = min(tm_t, M), min(tn_t, D_out), min(tk_t, D_in)
        return (2 * tm * tk * x_bytes                 # x (double-buffered)
                + 2 * n_out * tn * tk * w_bytes       # weights
                + 2 * n_out * tn * 4                  # biases (f32)
                + 2 * n_out * tm * tn * o_bytes       # outputs
                + n_out * tm * tn * 4)                # f32 accumulators

    while est(tm_t, tn_t, tk_t) > 0.4 * budget and tk_t > 256:
        tk_t //= 2
    while est(tm_t, tn_t, tk_t) > 0.4 * budget and tm_t > 128:
        tm_t //= 2

    tm = _tile(M, tm_t, 8)
    tn = _tile(D_out, tn_t, 128)
    tk = _tile(D_in, tk_t, 128)
    return tm, tn, tk, est(tm, tn, tk)


def _projections(x2d, weights, biases, out_dtype):
    """Tiled, pipelined y_i = x2d @ W_i^T + b_i for every (W_i, b_i) pair."""
    M, D_in = x2d.shape
    n_out = len(weights)
    D_out = weights[0].shape[0]

    budget = _vmem_capacity_bytes()
    x_bytes = x2d.dtype.itemsize
    w_bytes = weights[0].dtype.itemsize
    o_bytes = jnp.dtype(out_dtype).itemsize
    tm, tn, tk, ws = _proj_tile_sizes(M, D_in, D_out, n_out,
                                      x_bytes, w_bytes, o_bytes, budget)
    grid = (M // tm, D_out // tn, D_in // tk)

    in_specs = [pl.BlockSpec((tm, tk), lambda i, j, k: (i, k))]
    in_specs += [pl.BlockSpec((tn, tk), lambda i, j, k: (j, k))
                 for _ in range(n_out)]
    in_specs += [pl.BlockSpec((1, tn), lambda i, j, k: (0, j))
                 for _ in range(n_out)]

    flops = 2 * M * D_in * D_out * n_out
    bytes_accessed = (M * D_in * x_bytes * (D_out // tn)           # x re-reads
                      + n_out * D_out * D_in * w_bytes * (M // tm)  # W re-reads
                      + n_out * (M * D_out * o_bytes + D_out * 4))
    vlim = int(min(0.8 * budget, max(32 * 1024 * 1024, 3 * ws)))

    return pl.pallas_call(
        _make_proj_kernel(n_out),
        out_shape=[jax.ShapeDtypeStruct((M, D_out), out_dtype)
                   for _ in range(n_out)],
        grid=grid,
        in_specs=in_specs,
        out_specs=[pl.BlockSpec((tm, tn), lambda i, j, k: (i, j))
                   for _ in range(n_out)],
        scratch_shapes=[pltpu.VMEM((tm, tn), jnp.float32)
                        for _ in range(n_out)],
        compiler_params=pltpu.CompilerParams(
            dimension_semantics=("parallel", "parallel", "arbitrary"),
            vmem_limit_bytes=vlim),
        cost_estimate=pl.CostEstimate(
            flops=flops, transcendentals=0, bytes_accessed=bytes_accessed),
    )(x2d, *weights,
      *[b.astype(jnp.float32).reshape(1, D_out) for b in biases])


# --------------------------------------------------------------------------
# kernel 2: flash attention, all heads per grid step, [B, S, D] layout
# --------------------------------------------------------------------------

def _flash_mha_kernel(*refs, num_heads, d_k, has_mask, causal, tq, tkv):
    if has_mask:
        q_ref, k_ref, v_ref, mask_ref, o_ref, m_ref, l_ref, acc_ref = refs
    else:
        q_ref, k_ref, v_ref, o_ref, m_ref, l_ref, acc_ref = refs
        mask_ref = None

    qi = pl.program_id(1)
    ki = pl.program_id(2)

    @pl.when(ki == 0)
    def _init():
        m_ref[...] = jnp.full(m_ref.shape, -jnp.inf, m_ref.dtype)
        l_ref[...] = jnp.zeros(l_ref.shape, l_ref.dtype)
        acc_ref[...] = jnp.zeros(acc_ref.shape, acc_ref.dtype)

    def _compute():
        q_tile = q_ref[0]                      # [tq, D], compute dtype
        k_tile = k_ref[0]                      # [tkv, D]
        v_tile = v_ref[0]                      # [tkv, D]

        if has_mask:
            add_mask = mask_ref[...].astype(jnp.float32)       # [tq, tkv]
        elif causal:
            # Synthesize the causal mask in-kernel (VPU filler, no HBM mask).
            row = qi * tq + jax.lax.broadcasted_iota(jnp.int32, (tq, tkv), 0)
            col = ki * tkv + jax.lax.broadcasted_iota(jnp.int32, (tq, tkv), 1)
            add_mask = jnp.where(col <= row, 0.0, -1e30).astype(jnp.float32)
        else:
            add_mask = None

        # Static head unroll; per-head s/p are reduced to [tq, d_k]/[tq, 1]
        # within each iteration. (For very large H, a head-group grid axis
        # would bound live ranges further.)
        pv_parts, alpha_parts, m_parts, l_parts = [], [], [], []
        for h in range(num_heads):
            lo = h * d_k
            q_h = q_tile[:, lo:lo + d_k]               # already scaled, compute dtype
            k_h = k_tile[:, lo:lo + d_k]
            v_h = v_tile[:, lo:lo + d_k]

            # q_h @ k_h^T without materializing a transposed copy of k.
            s = jax.lax.dot_general(q_h, k_h, (((1,), (1,)), ((), ())),
                                    preferred_element_type=jnp.float32)
            if add_mask is not None:
                s = s + add_mask

            m_prev = m_ref[:, h:h + 1]                 # [tq, 1] f32
            l_prev = l_ref[:, h:h + 1]
            m_new = jnp.maximum(m_prev, jnp.max(s, axis=-1, keepdims=True))
            alpha = jnp.exp(m_prev - m_new)
            p = jnp.exp(s - m_new)                     # f32 softmax statistics

            l_parts.append(alpha * l_prev + jnp.sum(p, axis=-1, keepdims=True))
            pv_parts.append(jnp.dot(p.astype(v_h.dtype), v_h,
                                    preferred_element_type=jnp.float32))
            alpha_parts.append(jnp.broadcast_to(alpha, (tq, d_k)))
            m_parts.append(m_new)

        # Single lane-dense pass over the full [tq, D] accumulator and a
        # single lane-dense write of m/l (no per-head partial-lane stores).
        alpha_full = jnp.concatenate(alpha_parts, axis=-1)     # [tq, D]
        pv_full = jnp.concatenate(pv_parts, axis=-1)           # [tq, D]
        acc_ref[...] = alpha_full * acc_ref[...] + pv_full
        m_ref[...] = jnp.concatenate(m_parts, axis=-1)         # [tq, H]
        l_ref[...] = jnp.concatenate(l_parts, axis=-1)

    if causal:
        # Skip kv tiles that lie entirely above the diagonal (~2x fewer
        # QK^T / P@V matmuls and exps for causal attention).
        pl.when(ki * tkv <= (qi + 1) * tq - 1)(_compute)
    else:
        _compute()

    @pl.when(ki == pl.num_programs(2) - 1)
    def _finalize():
        inv_l = pl.reciprocal(l_ref[...], approx=True)         # EUP, [tq, H]
        inv_full = jnp.concatenate(
            [jnp.broadcast_to(inv_l[:, h:h + 1], (tq, d_k))
             for h in range(num_heads)], axis=-1)              # [tq, D]
        # One lane-dense output store over the full d_model width.
        o_ref[0] = (acc_ref[...] * inv_full).astype(o_ref.dtype)


def _flash_attention(q, k, v, num_heads, *, mask=None, causal=False):
    """Flash attention; q/k/v and the output stay in [B, S, d_model] layout."""
    B, Sq, D = q.shape
    _, Skv, _ = k.shape
    d_k = D // num_heads
    has_mask = mask is not None

    in_bytes = q.dtype.itemsize
    out_bytes = in_bytes
    budget = _vmem_capacity_bytes()

    tq_t, tkv_t = 256, 512

    def est(tq_t, tkv_t):
        tq_, tkv_ = min(tq_t, Sq), min(tkv_t, Skv)
        e = (2 * tq_ * D * in_bytes                    # q (double-buffered)
             + 2 * 2 * tkv_ * D * in_bytes             # k, v
             + 2 * tq_ * D * out_bytes                 # out
             + tq_ * D * 4 + 2 * tq_ * num_heads * 4   # acc + m + l scratch
             + 2 * tq_ * tkv_ * 4)                     # s/p transients
        if has_mask:
            e += 2 * tq_ * tkv_ * 4
        return e

    # Generation-aware shrink: keep the working set well under the per-core
    # VMEM capacity (64 MiB on v7x vs 128 MiB on v5e/v6e).
    while est(tq_t, tkv_t) > 0.45 * budget and tkv_t > 128:
        tkv_t //= 2
    while est(tq_t, tkv_t) > 0.45 * budget and tq_t > 64:
        tq_t //= 2

    tq = _tile(Sq, tq_t, 8)
    tkv = _tile(Skv, tkv_t, 128)
    grid = (B, Sq // tq, Skv // tkv)

    kernel = functools.partial(
        _flash_mha_kernel, num_heads=num_heads, d_k=d_k,
        has_mask=has_mask, causal=causal, tq=tq, tkv=tkv)

    in_specs = [
        pl.BlockSpec((1, tq, D), lambda b, qi, ki: (b, qi, 0)),
        pl.BlockSpec((1, tkv, D), lambda b, qi, ki: (b, ki, 0)),
        pl.BlockSpec((1, tkv, D), lambda b, qi, ki: (b, ki, 0)),
    ]
    inputs = [q, k, v]
    if has_mask:
        in_specs.append(pl.BlockSpec((tq, tkv), lambda b, qi, ki: (qi, ki)))
        inputs.append(mask.astype(jnp.float32))

    flops = 4 * B * Sq * Skv * D
    transcendentals = B * num_heads * Sq * Skv
    if causal:
        flops //= 2
        transcendentals //= 2
    bytes_accessed = (B * Sq * D * in_bytes
                      + 2 * B * (Sq // tq) * Skv * D * in_bytes
                      + B * Sq * D * out_bytes
                      + (B * Sq * Skv * 4 if has_mask else 0))
    vlim = int(min(0.8 * budget, max(32 * 1024 * 1024, 3 * est(tq, tkv))))

    return pl.pallas_call(
        kernel,
        out_shape=jax.ShapeDtypeStruct((B, Sq, D), q.dtype),
        grid=grid,
        in_specs=in_specs,
        out_specs=pl.BlockSpec((1, tq, D), lambda b, qi, ki: (b, qi, 0)),
        scratch_shapes=[
            pltpu.VMEM((tq, num_heads), jnp.float32),   # running max m
            pltpu.VMEM((tq, num_heads), jnp.float32),   # running sum l
            pltpu.VMEM((tq, D), jnp.float32),           # [tq, D] accumulator
        ],
        compiler_params=pltpu.CompilerParams(
            dimension_semantics=("parallel", "parallel", "arbitrary"),
            vmem_limit_bytes=vlim),
        cost_estimate=pl.CostEstimate(
            flops=flops, transcendentals=transcendentals,
            bytes_accessed=bytes_accessed),
    )(*inputs)


# --------------------------------------------------------------------------
# forward pass (== MultiHeadedAttention.forward, eval mode)
# --------------------------------------------------------------------------

def multi_headed_attention(params, query, key, value, h, mask=None,
                           causal=False, compute_dtype=None):
    """Forward pass equivalent to MultiHeadedAttention.forward (eval mode).

    `mask`, if given, is additive with shape [S_q, S_kv] (the PyTorch module
    broadcasts it over batch and heads). `causal=True` builds the causal mask
    in-kernel (no HBM mask array) and skips fully-masked kv tiles; `mask` is
    ignored in that case. `compute_dtype` optionally carries activations and
    matmul operands in e.g. bf16 end-to-end; accumulation, bias adds and
    softmax statistics remain f32.
    """
    B, Sq, D = query.shape
    _, Skv, _ = key.shape
    assert D % h == 0
    d_k = D // h
    if compute_dtype is None:
        compute_dtype = query.dtype
    compute_dtype = jnp.dtype(compute_dtype)
    out_dtype = query.dtype

    fused_qkv = (query is key) and (query is value)
    shared_kv = key is value

    (Wq, bq), (Wk, bk), (Wv, bv), (Wo, bo) = params
    # Fold the 1/sqrt(d_k) softmax scale into the Q projection once (O(D^2)).
    sm_scale = 1.0 / math.sqrt(d_k)
    Wq = Wq * sm_scale
    bq = bq * sm_scale

    # Cast matmul operands once in the wrapper so every projection / attention
    # DMA tile (x, W, q/k/v, ctx) travels in compute_dtype.
    cast = lambda a: a.astype(compute_dtype)
    Wq, Wk, Wv, Wo = cast(Wq), cast(Wk), cast(Wv), cast(Wo)
    q_x = cast(query.reshape(B * Sq, D))
    k_x = cast(key.reshape(B * Skv, D))
    v_x = cast(value.reshape(B * Skv, D))

    # Fused projections: one pallas_call (one HBM read of x) for every group
    # of projections that share the same input tensor.
    if fused_qkv:
        q2d, k2d, v2d = _projections(q_x, (Wq, Wk, Wv), (bq, bk, bv),
                                     compute_dtype)
    elif shared_kv:
        q2d, = _projections(q_x, (Wq,), (bq,), compute_dtype)
        k2d, v2d = _projections(k_x, (Wk, Wv), (bk, bv), compute_dtype)
    else:
        q2d, = _projections(q_x, (Wq,), (bq,), compute_dtype)
        k2d, = _projections(k_x, (Wk,), (bk,), compute_dtype)
        v2d, = _projections(v_x, (Wv,), (bv,), compute_dtype)

    # Attention consumes/produces [B, S, D]; head slicing happens inside the
    # kernel, so there are no [B,S,h,d_k]<->[B,h,S,d_k] transposes anywhere.
    ctx = _flash_attention(q2d.reshape(B, Sq, D), k2d.reshape(B, Skv, D),
                           v2d.reshape(B, Skv, D), h,
                           mask=None if causal else mask,
                           causal=causal)                       # [B, Sq, D]

    out2d, = _projections(ctx.reshape(B * Sq, D), (Wo,), (bo,), out_dtype)
    return out2d.reshape(B, Sq, D)


# --------------------------------------------------------------------------
# pure-JAX reference (mirrors the PyTorch module, eval mode)
# --------------------------------------------------------------------------

def reference_mha(params, query, key, value, h, mask=None):
    B, Sq, D = query.shape
    d_k = D // h
    (Wq, bq), (Wk, bk), (Wv, bv), (Wo, bo) = params

    def lin(x, W, b):
        return x @ W.T + b

    def heads(x, S):
        return x.reshape(B, S, h, d_k).transpose(0, 2, 1, 3)

    q = heads(lin(query, Wq, bq), Sq)
    k = heads(lin(key, Wk, bk), key.shape[1])
    v = heads(lin(value, Wv, bv), value.shape[1])
    scores = jnp.einsum("bhqd,bhkd->bhqk", q, k) / math.sqrt(d_k)
    if mask is not None:
        scores = scores + mask[None, None]
    p = jax.nn.softmax(scores, axis=-1)
    ctx = jnp.einsum("bhqk,bhkd->bhqd", p, v)
    ctx = ctx.transpose(0, 2, 1, 3).reshape(B, Sq, D)
    return lin(ctx, Wo, bo)


# --------------------------------------------------------------------------
# deterministic param init (nn.Linear default-style uniform init)
# --------------------------------------------------------------------------

def init_params(key, d_model):
    params = []
    for _ in range(4):
        kw, kb, key = jax.random.split(key, 3)
        bound = 1.0 / math.sqrt(d_model)
        W = jax.random.uniform(kw, (d_model, d_model), jnp.float32, -bound, bound)
        b = jax.random.uniform(kb, (d_model,), jnp.float32, -bound, bound)
        params.append((W, b))
    return params


# --------------------------------------------------------------------------
# main
# --------------------------------------------------------------------------

if __name__ == "__main__":
    B, S, D, H = 2, 8, 32, 4
    root = jax.random.PRNGKey(0)
    kx, k1, k2, k3, kp = jax.random.split(root, 5)

    x = jax.random.normal(kx, (B, S, D), jnp.float32)
    params = init_params(kp, D)
    # additive causal mask (0 on allowed, -1e9 on disallowed), as the PyTorch
    # module would receive it (broadcast over batch and heads).
    causal_mask = jnp.where(jnp.tril(jnp.ones((S, S), dtype=bool)),
                            0.0, -1e9).astype(jnp.float32)
    ref_causal = reference_mha(params, x, x, x, H, mask=causal_mask)

    # 1) self-attention, explicit additive mask (mask-ref kernel variant), f32
    out1 = jax.block_until_ready(
        multi_headed_attention(params, x, x, x, H, mask=causal_mask))
    assert out1.shape == (B, S, D)
    assert bool(jnp.allclose(out1, ref_causal, rtol=2e-2, atol=2e-2)), (
        "max err %.3e" % float(jnp.max(jnp.abs(out1 - ref_causal))))

    # 2) self-attention, causal=True (in-kernel iota mask + tile skip), f32
    out2 = jax.block_until_ready(
        multi_headed_attention(params, x, x, x, H, causal=True))
    assert bool(jnp.allclose(out2, ref_causal, rtol=2e-2, atol=2e-2)), (
        "max err %.3e" % float(jnp.max(jnp.abs(out2 - ref_causal))))

    # 3) cross-attention (separate projection path), maskless kernel, f32
    q_in = jax.random.normal(k1, (B, S, D), jnp.float32)
    k_in = jax.random.normal(k2, (B, S, D), jnp.float32)
    v_in = jax.random.normal(k3, (B, S, D), jnp.float32)
    out3 = jax.block_until_ready(
        multi_headed_attention(params, q_in, k_in, v_in, H, mask=None))
    ref3 = reference_mha(params, q_in, k_in, v_in, H, mask=None)
    assert bool(jnp.allclose(out3, ref3, rtol=2e-2, atol=2e-2)), (
        "max err %.3e" % float(jnp.max(jnp.abs(out3 - ref3))))

    # 4) bf16 activations/weights end-to-end (f32 accumulation & softmax stats)
    out4 = jax.block_until_ready(
        multi_headed_attention(params, x, x, x, H, causal=True,
                               compute_dtype=jnp.bfloat16))
    assert out4.shape == (B, S, D)
    assert bool(jnp.all(jnp.isfinite(out4)))
    assert bool(jnp.allclose(out4, ref_causal, rtol=1e-1, atol=1e-1))

    print("KERNEL_OK")
</pallas_src>

<mosaic_0001>
module attributes {stable_mosaic.version = 11 : i64} {
  func.func @kernel(%arg0: i32, %arg1: i32, %arg2: i32, %arg3: memref<16x32xf32, #tpu.memory_space<vmem>>, %arg4: memref<32x32xf32, #tpu.memory_space<vmem>>, %arg5: memref<32x32xf32, #tpu.memory_space<vmem>>, %arg6: memref<32x32xf32, #tpu.memory_space<vmem>>, %arg7: memref<1x32xf32, #tpu.memory_space<vmem>>, %arg8: memref<1x32xf32, #tpu.memory_space<vmem>>, %arg9: memref<1x32xf32, #tpu.memory_space<vmem>>, %arg10: memref<16x32xf32, #tpu.memory_space<vmem>>, %arg11: memref<16x32xf32, #tpu.memory_space<vmem>>, %arg12: memref<16x32xf32, #tpu.memory_space<vmem>>, %arg13: memref<16x32xf32, #tpu.memory_space<vmem>>, %arg14: memref<16x32xf32, #tpu.memory_space<vmem>>, %arg15: memref<16x32xf32, #tpu.memory_space<vmem>>) attributes {dimension_semantics = [#tpu.dimension_semantics<parallel>, #tpu.dimension_semantics<parallel>, #tpu.dimension_semantics<arbitrary>], iteration_bounds = array<i64: 1, 1, 1>, scalar_prefetch = 0 : i64, scratch_operands = 3 : i64, tpu.core_type = #tpu.core_type<tc>, window_params = [{transform_indices = @transform_0, window_bounds = array<i64: 16, 32>}, {transform_indices = @transform_1, window_bounds = array<i64: 32, 32>}, {transform_indices = @transform_2, window_bounds = array<i64: 32, 32>}, {transform_indices = @transform_3, window_bounds = array<i64: 32, 32>}, {transform_indices = @transform_4, window_bounds = array<i64: 1, 32>}, {transform_indices = @transform_5, window_bounds = array<i64: 1, 32>}, {transform_indices = @transform_6, window_bounds = array<i64: 1, 32>}, {transform_indices = @transform_7, window_bounds = array<i64: 16, 32>}, {transform_indices = @transform_8, window_bounds = array<i64: 16, 32>}, {transform_indices = @transform_9, window_bounds = array<i64: 16, 32>}]} {
    %c0_i32 = arith.constant 0 : i32
    %0 = arith.cmpi eq, %arg2, %c0_i32 : i32
    %1 = arith.extui %0 : i1 to i32
    %c0_i32_0 = arith.constant 0 : i32
    %2 = arith.cmpi ne, %1, %c0_i32_0 : i32
    scf.if %2 {
      %cst_24 = arith.constant 0.000000e+00 : f32
      %22 = vector.broadcast %cst_24 : f32 to vector<16x32xf32>
      %c0_25 = arith.constant 0 : index
      %c0_26 = arith.constant 0 : index
      %23 = vector.load %arg13[%c0_25, %c0_26] : memref<16x32xf32, #tpu.memory_space<vmem>>, vector<16x32xf32>
      tpu.vector_store %arg13[%c0_25, %c0_26], %22 {strides = array<i32>} : memref<16x32xf32, #tpu.memory_space<vmem>>, vector<16x32xf32>,
      %cst_27 = arith.constant 0.000000e+00 : f32
      %24 = vector.broadcast %cst_27 : f32 to vector<16x32xf32>
      %c0_28 = arith.constant 0 : index
      %c0_29 = arith.constant 0 : index
      %25 = vector.load %arg14[%c0_28, %c0_29] : memref<16x32xf32, #tpu.memory_space<vmem>>, vector<16x32xf32>
      tpu.vector_store %arg14[%c0_28, %c0_29], %24 {strides = array<i32>} : memref<16x32xf32, #tpu.memory_space<vmem>>, vector<16x32xf32>,
      %cst_30 = arith.constant 0.000000e+00 : f32
      %26 = vector.broadcast %cst_30 : f32 to vector<16x32xf32>
      %c0_31 = arith.constant 0 : index
      %c0_32 = arith.constant 0 : index
      %27 = vector.load %arg15[%c0_31, %c0_32] : memref<16x32xf32, #tpu.memory_space<vmem>>, vector<16x32xf32>
      tpu.vector_store %arg15[%c0_31, %c0_32], %26 {strides = array<i32>} : memref<16x32xf32, #tpu.memory_space<vmem>>, vector<16x32xf32>,
    } else {
    }
    %c0 = arith.constant 0 : index
    %c0_1 = arith.constant 0 : index
    %3 = vector.load %arg3[%c0, %c0_1] : memref<16x32xf32, #tpu.memory_space<vmem>>, vector<16x32xf32>
    %c0_2 = arith.constant 0 : index
    %c0_3 = arith.constant 0 : index
    %4 = vector.load %arg13[%c0_2, %c0_3] : memref<16x32xf32, #tpu.memory_space<vmem>>, vector<16x32xf32>
    %c0_4 = arith.constant 0 : index
    %c0_5 = arith.constant 0 : index
    %5 = vector.load %arg4[%c0_4, %c0_5] : memref<32x32xf32, #tpu.memory_space<vmem>>, vector<32x32xf32>
    %cst = arith.constant dense<0.000000e+00> : vector<16x32xf32>
    %6 = tpu.matmul %3, %5, %cst {dimension_numbers = #tpu.dot_dimension_numbers<[1], [1], [0], [0], [0, 0, 1, 0], [], []>} : vector<16x32xf32>, vector<32x32xf32>, vector<16x32xf32> -> vector<16x32xf32>
    %7 = arith.addf %4, %6 : vector<16x32xf32>
    %c0_6 = arith.constant 0 : index
    %c0_7 = arith.constant 0 : index
    %8 = vector.load %arg13[%c0_6, %c0_7] : memref<16x32xf32, #tpu.memory_space<vmem>>, vector<16x32xf32>
    tpu.vector_store %arg13[%c0_6, %c0_7], %7 {strides = array<i32>} : memref<16x32xf32, #tpu.memory_space<vmem>>, vector<16x32xf32>,
    %c0_8 = arith.constant 0 : index
    %c0_9 = arith.constant 0 : index
    %9 = vector.load %arg14[%c0_8, %c0_9] : memref<16x32xf32, #tpu.memory_space<vmem>>, vector<16x32xf32>
    %c0_10 = arith.constant 0 : index
    %c0_11 = arith.constant 0 : index
    %10 = vector.load %arg5[%c0_10, %c0_11] : memref<32x32xf32, #tpu.memory_space<vmem>>, vector<32x32xf32>
    %cst_12 = arith.constant dense<0.000000e+00> : vector<16x32xf32>
    %11 = tpu.matmul %3, %10, %cst_12 {dimension_numbers = #tpu.dot_dimension_numbers<[1], [1], [0], [0], [0, 0, 1, 0], [], []>} : vector<16x32xf32>, vector<32x32xf32>, vector<16x32xf32> -> vector<16x32xf32>
    %12 = arith.addf %9, %11 : vector<16x32xf32>
    %c0_13 = arith.constant 0 : index
    %c0_14 = arith.constant 0 : index
    %13 = vector.load %arg14[%c0_13, %c0_14] : memref<16x32xf32, #tpu.memory_space<vmem>>, vector<16x32xf32>
    tpu.vector_store %arg14[%c0_13, %c0_14], %12 {strides = array<i32>} : memref<16x32xf32, #tpu.memory_space<vmem>>, vector<16x32xf32>,
    %c0_15 = arith.constant 0 : index
    %c0_16 = arith.constant 0 : index
    %14 = vector.load %arg15[%c0_15, %c0_16] : memref<16x32xf32, #tpu.memory_space<vmem>>, vector<16x32xf32>
    %c0_17 = arith.constant 0 : index
    %c0_18 = arith.constant 0 : index
    %15 = vector.load %arg6[%c0_17, %c0_18] : memref<32x32xf32, #tpu.memory_space<vmem>>, vector<32x32xf32>
    %cst_19 = arith.constant dense<0.000000e+00> : vector<16x32xf32>
    %16 = tpu.matmul %3, %15, %cst_19 {dimension_numbers = #tpu.dot_dimension_numbers<[1], [1], [0], [0], [0, 0, 1, 0], [], []>} : vector<16x32xf32>, vector<32x32xf32>, vector<16x32xf32> -> vector<16x32xf32>
    %17 = arith.addf %14, %16 : vector<16x32xf32>
    %c0_20 = arith.constant 0 : index
    %c0_21 = arith.constant 0 : index
    %18 = vector.load %arg15[%c0_20, %c0_21] : memref<16x32xf32, #tpu.memory_space<vmem>>, vector<16x32xf32>
    tpu.vector_store %arg15[%c0_20, %c0_21], %17 {strides = array<i32>} : memref<16x32xf32, #tpu.memory_space<vmem>>, vector<16x32xf32>,
    %c0_i32_22 = arith.constant 0 : i32
    %19 = arith.cmpi eq, %arg2, %c0_i32_22 : i32
    %20 = arith.extui %19 : i1 to i32
    %c0_i32_23 = arith.constant 0 : i32
    %21 = arith.cmpi ne, %20, %c0_i32_23 : i32
    scf.if %21 {
      %c0_24 = arith.constant 0 : index
      %c0_25 = arith.constant 0 : index
      %22 = vector.load %arg13[%c0_24, %c0_25] : memref<16x32xf32, #tpu.memory_space<vmem>>, vector<16x32xf32>
      %c0_26 = arith.constant 0 : index
      %c0_27 = arith.constant 0 : index
      %23 = vector.load %arg7[%c0_26, %c0_27] : memref<1x32xf32, #tpu.memory_space<vmem>>, vector<1x32xf32>
      %24 = vector.broadcast %23 : vector<1x32xf32> to vector<16x32xf32>
      %25 = arith.addf %22, %24 : vector<16x32xf32>
      %c0_28 = arith.constant 0 : index
      %c0_29 = arith.constant 0 : index
      %26 = vector.load %arg10[%c0_28, %c0_29] : memref<16x32xf32, #tpu.memory_space<vmem>>, vector<16x32xf32>
      tpu.vector_store %arg10[%c0_28, %c0_29], %25 {strides = array<i32>} : memref<16x32xf32, #tpu.memory_space<vmem>>, vector<16x32xf32>,
      %c0_30 = arith.constant 0 : index
      %c0_31 = arith.constant 0 : index
      %27 = vector.load %arg14[%c0_30, %c0_31] : memref<16x32xf32, #tpu.memory_space<vmem>>, vector<16x32xf32>
      %c0_32 = arith.constant 0 : index
      %c0_33 = arith.constant 0 : index
      %28 = vector.load %arg8[%c0_32, %c0_33] : memref<1x32xf32, #tpu.memory_space<vmem>>, vector<1x32xf32>
      %29 = vector.broadcast %28 : vector<1x32xf32> to vector<16x32xf32>
      %30 = arith.addf %27, %29 : vector<16x32xf32>
      %c0_34 = arith.constant 0 : index
      %c0_35 = arith.constant 0 : index
      %31 = vector.load %arg11[%c0_34, %c0_35] : memref<16x32xf32, #tpu.memory_space<vmem>>, vector<16x32xf32>
      tpu.vector_store %arg11[%c0_34, %c0_35], %30 {strides = array<i32>} : memref<16x32xf32, #tpu.memory_space<vmem>>, vector<16x32xf32>,
      %c0_36 = arith.constant 0 : index
      %c0_37 = arith.constant 0 : index
      %32 = vector.load %arg15[%c0_36, %c0_37] : memref<16x32xf32, #tpu.memory_space<vmem>>, vector<16x32xf32>
      %c0_38 = arith.constant 0 : index
      %c0_39 = arith.constant 0 : index
      %33 = vector.load %arg9[%c0_38, %c0_39] : memref<1x32xf32, #tpu.memory_space<vmem>>, vector<1x32xf32>
      %34 = vector.broadcast %33 : vector<1x32xf32> to vector<16x32xf32>
      %35 = arith.addf %32, %34 : vector<16x32xf32>
      %c0_40 = arith.constant 0 : index
      %c0_41 = arith.constant 0 : index
      %36 = vector.load %arg12[%c0_40, %c0_41] : memref<16x32xf32, #tpu.memory_space<vmem>>, vector<16x32xf32>
      tpu.vector_store %arg12[%c0_40, %c0_41], %35 {strides = array<i32>} : memref<16x32xf32, #tpu.memory_space<vmem>>, vector<16x32xf32>,
    } else {
    }
    return
  }
  func.func @transform_0(%arg0: i32, %arg1: i32, %arg2: i32) -> (i32, i32) {
    %c0_i32 = arith.constant 0 : i32
    return %arg0, %arg2 : i32, i32
  }
  func.func @transform_1(%arg0: i32, %arg1: i32, %arg2: i32) -> (i32, i32) {
    %c0_i32 = arith.constant 0 : i32
    return %arg1, %arg2 : i32, i32
  }
  func.func @transform_2(%arg0: i32, %arg1: i32, %arg2: i32) -> (i32, i32) {
    %c0_i32 = arith.constant 0 : i32
    return %arg1, %arg2 : i32, i32
  }
  func.func @transform_3(%arg0: i32, %arg1: i32, %arg2: i32) -> (i32, i32) {
    %c0_i32 = arith.constant 0 : i32
    return %arg1, %arg2 : i32, i32
  }
  func.func @transform_4(%arg0: i32, %arg1: i32, %arg2: i32) -> (i32, i32) {
    %c0_i32 = arith.constant 0 : i32
    %c0_i32_0 = arith.constant 0 : i32
    return %c0_i32, %arg1 : i32, i32
  }
  func.func @transform_5(%arg0: i32, %arg1: i32, %arg2: i32) -> (i32, i32) {
    %c0_i32 = arith.constant 0 : i32
    %c0_i32_0 = arith.constant 0 : i32
    return %c0_i32, %arg1 : i32, i32
  }
  func.func @transform_6(%arg0: i32, %arg1: i32, %arg2: i32) -> (i32, i32) {
    %c0_i32 = arith.constant 0 : i32
    %c0_i32_0 = arith.constant 0 : i32
    return %c0_i32, %arg1 : i32, i32
  }
  func.func @transform_7(%arg0: i32, %arg1: i32, %arg2: i32) -> (i32, i32) {
    %c0_i32 = arith.constant 0 : i32
    return %arg0, %arg1 : i32, i32
  }
  func.func @transform_8(%arg0: i32, %arg1: i32, %arg2: i32) -> (i32, i32) {
    %c0_i32 = arith.constant 0 : i32
    return %arg0, %arg1 : i32, i32
  }
  func.func @transform_9(%arg0: i32, %arg1: i32, %arg2: i32) -> (i32, i32) {
    %c0_i32 = arith.constant 0 : i32
    return %arg0, %arg1 : i32, i32
  }
}

</mosaic_0001>

<bundles_post_ra>
// kernel: tpu_custom_call.1
= control target key start
LH: loop header
LB: loop body
LE: loop exit
PB: predicated region body
PF: predicated region fallthrough
CT: control target
= control target key end

     0   :  { %15 = vsyncpa [#allocation6], 0  ;;  %s880_s0 = inlined_call_operand.hbm [shape: f32[16,32], index: 0, kind: input, shape index: {}]   ;;  %s881_s1 = inlined_call_operand.hbm [shape: f32[32,32], index: 1, kind: input, shape index: {}]   ;;  %s882_s2 = inlined_call_operand.hbm [shape: f32[32,32], index: 2, kind: input, shape index: {}]   ;;  %s883_s3 = inlined_call_operand.hbm [shape: f32[32,32], index: 3, kind: input, shape index: {}]   ;;  %s884_s4 = inlined_call_operand.vmem [shape: f32[1,32], index: 4, kind: input, shape index: {}]   ;;  %s885_s5 = inlined_call_operand.vmem [shape: f32[1,32], index: 5, kind: input, shape index: {}]   ;;  %s886_s6 = inlined_call_operand.vmem [shape: f32[1,32], index: 6, kind: input, shape index: {}]   ;;  %s887_s7 = inlined_call_operand.hbm [shape: f32[16,32], index: 7, kind: output, shape index: {0}]   ;;  %s888_s8 = inlined_call_operand.hbm [shape: f32[16,32], index: 8, kind: output, shape index: {1}]   ;;  %s889_s9 = inlined_call_operand.hbm [shape: f32[16,32], index: 9, kind: output, shape index: {2}]  }
   0x1   :  { %16 = vsyncpa [#allocation9], 0 }
   0x2   :  { %17 = vsyncpa [#allocation12], 0 }
   0x3   :  { %18 = vsyncpa [#allocation7], 0 }
   0x4   :  { %19 = vsyncpa [#allocation15], 0  ;;  %s721_s30 = smov [#allocation8]   ;;  %s722_s11 = smov [#allocation5]  }
   0x5   :  { %s37_s10 = sshll.u32 %s721_s30, 4  ;;  %s25_s12 = sshll.u32 %s722_s11, 4  ;;  %s38_s10 = int_to_ptr.vmem [resolvable:$true] %s37_s10  ;;  %s26_s12 = int_to_ptr.vmem [resolvable:$true] %s25_s12 }
   0x6   :  { %s579_s13 = scalar_lea.vmem %s38_s10, 512  ;;  %p584_p1 = scmp.lt.s32.totalorder %s38_s10, %s38_s10 }
   0x7   :  { %p580_p0 = scmp.ne.s32.totalorder %s38_s10, %s579_s13  ;;  %p585_p2 = scmp.lt.s32.totalorder %s579_s13, %s579_s13 }
   0x9   :  { %p586_p3 = por %p585_p2, %p584_p1 }
   0xb   :  { %p587_p4 = pnand %p586_p3, %p580_p0 }
   0xd   :  { %590 = shalt.err (!%p587_p4)
}
   0xe   :  { %s723_s14 = smov 128   ;;  %s724_s15 = smov 8  }
   0xf   :  { %43 = dma.hbm_to_vmem [thread:$0]  %s881_s1, 512, %s38_s10, [#allocation9], %s723_s14, %s723_s14, %s724_s15  }
  0x10   :  { %s599_s18 = scalar_lea.vmem %s26_s12, 256  ;;  %p604_p6 = scmp.lt.s32.totalorder %s26_s12, %s26_s12 }
  0x11   :  { %p600_p5 = scmp.ne.s32.totalorder %s26_s12, %s599_s18  ;;  %p605_p7 = scmp.lt.s32.totalorder %s599_s18, %s599_s18 }
  0x13   :  { %p606_p8 = por %p605_p7, %p604_p6 }
  0x15   :  { %p607_p9 = pnand %p606_p8, %p600_p5 }
  0x17   :  { %610 = shalt.err (!%p607_p9)
}
  0x18   :  { %31 = dma.hbm_to_vmem [thread:$0]  %s880_s0, 256, %s26_s12, [#allocation6], %s723_s14, %s723_s14, %s724_s15  }
  0x19   :  { %s725_s21 = smov [#allocation10]   ;;  %s726_s23 = smov [#allocation11]  }
  0x1a   :  { %s49_s22 = sshll.u32 %s725_s21, 4  ;;  %s61_s24 = sshll.u32 %s726_s23, 4  ;;  %s50_s22 = int_to_ptr.vmem [resolvable:$true] %s49_s22  ;;  %s62_s24 = int_to_ptr.vmem [resolvable:$true] %s61_s24 }
  0x1b   :  { %s619_s1 = scalar_lea.vmem %s50_s22, 512  ;;  %p624_p11 = scmp.lt.s32.totalorder %s50_s22, %s50_s22 }
  0x1c   :  { %p620_p10 = scmp.ne.s32.totalorder %s50_s22, %s619_s1  ;;  %p625_p12 = scmp.lt.s32.totalorder %s619_s1, %s619_s1 }
  0x1e   :  { %p626_p13 = por %p625_p12, %p624_p11 }
  0x20   :  { %p627_p0 = pnand %p626_p13, %p620_p10 }
  0x22   :  { %630 = shalt.err (!%p627_p0)
}
  0x23   :  { %55 = dma.hbm_to_vmem [thread:$0]  %s882_s2, 512, %s50_s22, [#allocation9], %s723_s14, %s723_s14, %s724_s15  }
  0x24   :  { %s639_s0 = scalar_lea.vmem %s62_s24, 512  ;;  %p644_p2 = scmp.lt.s32.totalorder %s62_s24, %s62_s24 }
  0x25   :  { %p640_p1 = scmp.ne.s32.totalorder %s62_s24, %s639_s0  ;;  %p645_p3 = scmp.lt.s32.totalorder %s639_s0, %s639_s0 }
  0x27   :  { %p646_p4 = por %p645_p3, %p644_p2 }
  0x29   :  { %p647_p5 = pnand %p646_p4, %p640_p1 }
  0x2b   :  { %650 = shalt.err (!%p647_p5)
}
  0x2c   :  { %67 = dma.hbm_to_vmem [thread:$0]  %s883_s3, 512, %s62_s24, [#allocation12], %s723_s14, %s723_s14, %s724_s15  }
  0x2d   :  { %711 = dma.done.wait [#allocation6], 256  }
  0x2e   :  { %712 = vsyncadd [#allocation6], 4294967040 }
  0x2f   :  { %713 = dma.done.wait [#allocation9], 1024  }
  0x30   :  { %714 = vsyncadd [#allocation9], 4294966272 }
  0x31   :  { %715 = dma.done.wait [#allocation12], 512  }
  0x32   :  { %716 = vsyncadd [#allocation12], 4294966784  ;;  %vm90_vm0 = vcmask 261120   ;;  %v727_v0 = vmov 0.0   ;;  %v104_v1 = vld [vmem:[#allocation8 + $0x18] sm:$0xff]  ;;  %v103_v2 = vld [vmem:[#allocation8 + $0x10] sm:$0xff] }
  0x33   :  { %92 = vst.msk [vmem:[#allocation2 + $0x8] sm:$0xff] %vm90_vm0, %v727_v0  ;;  %91 = vst.msk [vmem:[#allocation2] sm:$0xff] %vm90_vm0, %v727_v0  ;;  %528 = vmatprep.subr.msk.mxu0 %vm90_vm0, %v104_v1  ;;  %v208_v3 = vld [vmem:[#allocation10 + $0x18] sm:$0xff]  ;;  %v97_v4 = vld [vmem:[#allocation5] sm:$0xff]  ;;  %s728_s10 = smov [#allocation13]   ;;  %s729_s12 = smov [#allocation14]  }
  0x34   :  { %93 = vst.msk [vmem:[#allocation3] sm:$0xff] %vm90_vm0, %v727_v0  ;;  %94 = vst.msk [vmem:[#allocation3 + $0x8] sm:$0xff] %vm90_vm0, %v727_v0  ;;  %529 = vmatpush3.xpose.msk.msra.mxu0 %vm90_vm0, %v104_v1  ;;  %539 = vmatprep.subr.msk.mxu1 %vm90_vm0, %v208_v3  ;;  %v207_v5 = vld [vmem:[#allocation10 + $0x10] sm:$0xff]  ;;  %v102_v6 = vld [vmem:[#allocation8 + $0x8] sm:$0xff]  ;;  %s444_s11 = sshll.u32 %s728_s10, 4  ;;  %s456_s13 = sshll.u32 %s729_s12, 4  ;;  %s445_s11 = int_to_ptr.vmem [resolvable:$true] %s444_s11  ;;  %s457_s13 = int_to_ptr.vmem [resolvable:$true] %s456_s13 }
  0x35   :  { %95 = vst.msk [vmem:[#allocation4] sm:$0xff] %vm90_vm0, %v727_v0  ;;  %96 = vst.msk [vmem:[#allocation4 + $0x8] sm:$0xff] %vm90_vm0, %v727_v0  ;;  %530 = vmatprep.subr.msk.mxu0 %vm90_vm0, %v103_v2  ;;  %540 = vmatpush3.xpose.msk.msra.mxu1 %vm90_vm0, %v208_v3  ;;  %v206_v7 = vld [vmem:[#allocation10 + $0x8] sm:$0xff]  ;;  %v101_v8 = vld [vmem:[#allocation8] sm:$0xff]  ;;  %p656_p7 = scmp.lt.s32.totalorder %s445_s11, %s445_s11 }
  0x36   :  { %536 = vmatprep.mubr.msk.f32.mxu0 %vm90_vm0, %v97_v4  ;;  %541 = vmatprep.subr.msk.mxu1 %vm90_vm0, %v207_v5  ;;  %v205_v9 = vld [vmem:[#allocation10] sm:$0xff]  ;;  %v305_v10 = vld [vmem:[#allocation11 + $0x18] sm:$0xff]  ;;  %v304_v12 = vld [vmem:[#allocation11 + $0x10] sm:$0xff] }
  0x37   :  { %547 = vmatprep.mubr.msk.f32.mxu1 %vm90_vm0, %v97_v4  ;;  %v98_v11 = vld [vmem:[#allocation5 + $0x8] sm:$0xff]  ;;  %v303_v13 = vld [vmem:[#allocation11 + $0x8] sm:$0xff]  ;;  %v302_v14 = vld [vmem:[#allocation11] sm:$0xff] }
  0x38   :  { %531 = vmatpush3.xpose.msk.msra.mxu0 %vm90_vm0, %v103_v2  ;;  %v507_v27 = vld [vmem:[%s884_s4] ss:$0 sm:$0xff]  ;;  %s651_s4 = scalar_lea.vmem %s445_s11, 256 }
  0x39   :  { %532 = vmatprep.subr.msk.mxu0 %vm90_vm0, %v102_v6  ;;  %542 = vmatpush3.xpose.msk.msra.mxu1 %vm90_vm0, %v207_v5  ;;  %v508_v28 = vld [vmem:[%s885_s5] ss:$0 sm:$0xff]  ;;  %p652_p6 = scmp.ne.s32.totalorder %s445_s11, %s651_s4  ;;  %p657_p8 = scmp.lt.s32.totalorder %s651_s4, %s651_s4 }
  0x3a   :  { %543 = vmatprep.subr.msk.mxu1 %vm90_vm0, %v206_v7  ;;  %v100_v15 = vld [vmem:[#allocation2 + $0x8] sm:$0xff]  ;;  %v99_v18 = vld [vmem:[#allocation2] sm:$0xff] }
  0x3b   :  { %v204_v16 = vld [vmem:[#allocation3 + $0x8] sm:$0xff]  ;;  %v203_v21 = vld [vmem:[#allocation3] sm:$0xff]  ;;  %p658_p9 = por %p657_p8, %p656_p7 }
  0x3c   :  { %533 = vmatpush3.xpose.msk.msra.mxu0 %vm90_vm0, %v102_v6  ;;  %v301_v36 = vld [vmem:[#allocation4 + $0x8] sm:$0xff]  ;;  %v300_v39 = vld [vmem:[#allocation4] sm:$0xff] }
  0x3d   :  { %534 = vmatprep.subr.msk.mxu0 %vm90_vm0, %v101_v8  ;;  %544 = vmatpush3.xpose.msk.msra.mxu1 %vm90_vm0, %v206_v7  ;;  %p659_p10 = pnand %p658_p9, %p652_p6 }
  0x3e   :  { %545 = vmatprep.subr.msk.mxu1 %vm90_vm0, %v205_v9 }
  0x40   :  { %535 = vmatpush3.xpose.msk.msra.mxu0 %vm90_vm0, %v101_v8 }
  0x41   :  { %550 = vmatprep.subr.msk.mxu0 %vm90_vm0, %v305_v10  ;;  %546 = vmatpush3.xpose.msk.msra.mxu1 %vm90_vm0, %v205_v9 }
  0x43   :  { %537 = vmatmul.mubr.msk.f32.vlgmr.msra.gmra.mxu0 %vm90_vm0, %v98_v11 }
  0x44   :  { %551 = vmatpush3.xpose.msk.msra.mxu0 %vm90_vm0, %v305_v10  ;;  %548 = vmatmul.mubr.msk.f32.vlgmr.msra.gmra.mxu1 %vm90_vm0, %v98_v11 }
  0x45   :  { %552 = vmatprep.subr.msk.mxu0 %vm90_vm0, %v304_v12  ;;  %558 = vmatprep.mubr.msk.f32.mxu0 %vm90_vm0, %v97_v4 }
  0x48   :  { %553 = vmatpush3.xpose.msk.msra.mxu0 %vm90_vm0, %v304_v12 }
  0x49   :  { %554 = vmatprep.subr.msk.mxu0 %vm90_vm0, %v303_v13 }
  0x4c   :  { %555 = vmatpush3.xpose.msk.msra.mxu0 %vm90_vm0, %v303_v13 }
  0x4d   :  { %556 = vmatprep.subr.msk.mxu0 %vm90_vm0, %v302_v14 }
  0x50   :  { %557 = vmatpush3.xpose.msk.msra.mxu0 %vm90_vm0, %v302_v14 }
  0x53   :  { %559 = vmatmul.mubr.msk.f32.vlgmr.msra.gmra.mxu0 %vm90_vm0, %v98_v11 }
 0x103   :  { %v538_v17 = vpop.f32.mrf.mxu0 }
 0x104   :  { %v200_v19 = vadd.f32 %v538_v17, %v100_v15  ;;  %v549_v20 = vpop.f32.mrf.mxu1 }
 0x105   :  { %v190_v22 = vpop.f32.mrf.mxu0  ;;  %v297_v23 = vadd.f32 %v549_v20, %v204_v16 }
 0x106   :  { %202 = vst.msk [vmem:[#allocation2 + $0x8] sm:$0xff] %vm90_vm0, %v200_v19  ;;  %v199_v24 = vadd.f32 %v190_v22, %v99_v18  ;;  %v287_v25 = vpop.f32.mrf.mxu1 }
 0x107   :  { %299 = vst.msk [vmem:[#allocation3 + $0x8] sm:$0xff] %vm90_vm0, %v297_v23  ;;  %v296_v26 = vadd.f32 %v287_v25, %v203_v21 }
 0x108   :  { %201 = vst.msk [vmem:[#allocation2] sm:$0xff] %vm90_vm0, %v199_v24 }
 0x109   :  { %298 = vst.msk [vmem:[#allocation3] sm:$0xff] %vm90_vm0, %v296_v26 }
 0x10d   :  { %v401_v29 = vld [vmem:[#allocation2 + $0x8] sm:$0xff] }
 0x10e   :  { %v414_v30 = vld [vmem:[#allocation3 + $0x8] sm:$0xff]  ;;  %v410_v31 = vadd.f32 %v507_v27, %v401_v29 }
 0x10f   :  { %v423_v32 = vadd.f32 %v508_v28, %v414_v30  ;;  %v400_v33 = vld [vmem:[#allocation2] sm:$0xff] }
 0x110   :  { %v413_v34 = vld [vmem:[#allocation3] sm:$0xff]  ;;  %v409_v35 = vadd.f32 %v507_v27, %v400_v33  ;;  %412 = vst.msk [vmem:[#allocation13 + $0x8] sm:$0xff] %vm90_vm0, %v410_v31 }
 0x111   :  { %v422_v37 = vadd.f32 %v508_v28, %v413_v34  ;;  %425 = vst.msk [vmem:[#allocation14 + $0x8] sm:$0xff] %vm90_vm0, %v423_v32 }
 0x112   :  { %411 = vst.msk [vmem:[#allocation13] sm:$0xff] %vm90_vm0, %v409_v35 }
 0x113   :  { %v560_v38 = vpop.f32.mrf.mxu0  ;;  %424 = vst.msk [vmem:[#allocation14] sm:$0xff] %vm90_vm0, %v422_v37 }
 0x114   :  { %662 = shalt.err (!%p659_p10)
}
 0x115   :  { %450 = dma.vmem_to_hbm [thread:$0]  %s445_s11, 256, %s887_s7, [#allocation7], %s723_s14, %s723_s14, %s724_s15   ;;  %v394_v40 = vadd.f32 %v560_v38, %v301_v36 }
 0x116   :  { %s671_s17 = scalar_lea.vmem %s457_s13, 256  ;;  %p676_p12 = scmp.lt.s32.totalorder %s457_s13, %s457_s13 }
 0x117   :  { %p672_p11 = scmp.ne.s32.totalorder %s457_s13, %s671_s17  ;;  %p677_p13 = scmp.lt.s32.totalorder %s671_s17, %s671_s17 }
 0x119   :  { %p678_p0 = por %p677_p13, %p676_p12 }
 0x11b   :  { %p679_p1 = pnand %p678_p0, %p672_p11 }
 0x11d   :  { %682 = shalt.err (!%p679_p1)
}
 0x11e   :  { %462 = dma.vmem_to_hbm [thread:$0]  %s457_s13, 256, %s888_s8, [#allocation15], %s723_s14, %s723_s14, %s724_s15   ;;  %v384_v41 = vpop.f32.mrf.mxu0  ;;  %396 = vst.msk [vmem:[#allocation4 + $0x8] sm:$0xff] %vm90_vm0, %v394_v40 }
 0x11f   :  { %v393_v42 = vadd.f32 %v384_v41, %v300_v39  ;;  %v509_v43 = vld [vmem:[%s886_s6] ss:$0 sm:$0xff]  ;;  %s730_s21 = smov [#allocation16]  }
 0x120   :  { %s468_s22 = sshll.u32 %s730_s21, 4  ;;  %s469_s22 = int_to_ptr.vmem [resolvable:$true] %s468_s22 }
 0x121   :  { %395 = vst.msk [vmem:[#allocation4] sm:$0xff] %vm90_vm0, %v393_v42  ;;  %s691_s8 = scalar_lea.vmem %s469_s22, 256  ;;  %p696_p3 = scmp.lt.s32.totalorder %s469_s22, %s469_s22 }
 0x122   :  { %p692_p2 = scmp.ne.s32.totalorder %s469_s22, %s691_s8  ;;  %p697_p4 = scmp.lt.s32.totalorder %s691_s8, %s691_s8 }
 0x124   :  { %p698_p5 = por %p697_p4, %p696_p3 }
 0x125   :  { %v427_v44 = vld [vmem:[#allocation4 + $0x8] sm:$0xff] }
 0x126   :  { %v436_v45 = vadd.f32 %v509_v43, %v427_v44  ;;  %p699_p6 = pnand %p698_p5, %p692_p2 }
 0x128   :  { %v426_v46 = vld [vmem:[#allocation4] sm:$0xff]  ;;  %438 = vst.msk [vmem:[#allocation16 + $0x8] sm:$0xff] %vm90_vm0, %v436_v45 }
 0x129   :  { %v435_v47 = vadd.f32 %v509_v43, %v426_v46 }
 0x12b   :  { %437 = vst.msk [vmem:[#allocation16] sm:$0xff] %vm90_vm0, %v435_v47 }
 0x12c   :  { %702 = shalt.err (!%p699_p6)
}
 0x12d   :  { %474 = dma.vmem_to_hbm [thread:$0]  %s469_s22, 256, %s889_s9, [#allocation15], %s723_s14, %s723_s14, %s724_s15  }
 0x12e   :  { %717 = dma.done.wait [#allocation7], 256  }
 0x12f   :  { %718 = vsyncadd [#allocation7], 4294967040 }
 0x130   :  { %719 = dma.done.wait [#allocation15], 512  }
 0x131   :  { %720 = vsyncadd [#allocation15], 4294966784 }
 0x132   :  { %484 = vsyncpa [#allocation6], 1 }
 0x133   :  { %485 = vsyncpa [#allocation9], 1 }
 0x134   :  { %486 = vsyncpa [#allocation12], 1 }
 0x135   :  { %487 = vsyncpa [#allocation7], 1 }
 0x136   :  { %488 = vsyncpa [#allocation15], 1 }

</bundles_post_ra>
